<compile_context>
chip_gen: v7x
topology: tpu7x:2x2x1
jax: 0.10.0
libtpu: 0.0.40
codegen_flags: <defaults>
</compile_context>

<pallas_src>
import functools

import jax
import jax.numpy as jnp
import numpy as np
from jax.experimental import pallas as pl
from jax.experimental.pallas import tpu as pltpu

KERNEL_SIZE = 2
BN_EPS = 1e-5


def _round_up(x, m):
    return (x + m - 1) // m * m


def _tcn_fused_kernel(x_ref, *refs, dilations, l0, l_pad):
    """All TCN levels fused for one batch item.

    x_ref : (Cin0, L0)   channels on sublanes, time on lanes.
    refs  : per level: w1a (Co,Ci), w1b (Co,Ci), s1 (Co,1),
                       w2a (Co,Co), w2b (Co,Co), s2 (Co,1)
            then o_ref (Co_last, Lpad), hbuf, xbuf (VMEM scratch).

    Conv1d(k=2, dilation=d, padding=d) on input of length L gives length L+d:
        y[t] = w_tap0 . x[t-d]   (valid for t >= d)
             + w_tap1 . x[t]     (valid for t <  L)
    so each conv is two plain matmuls on the un-padded input plus three
    offset region writes (no padded input copy).
    """
    num_levels = len(dilations)
    w_refs = refs[: 6 * num_levels]
    o_ref = refs[6 * num_levels]
    hbuf = refs[6 * num_levels + 1]
    xbuf = refs[6 * num_levels + 2]

    xv = x_ref[...]                                   # (Cin0, L0)
    li = l0
    for i in range(num_levels):
        d = dilations[i]
        w1a, w1b, s1, w2a, w2b, s2 = w_refs[6 * i: 6 * i + 6]
        co = w1a.shape[0]
        last = (i == num_levels - 1)

        # ---- conv1 + BN + ReLU (intermediate lives in VMEM scratch) --------
        ha = jnp.dot(w1a[...], xv, preferred_element_type=jnp.float32)   # tap 0
        hb = jnp.dot(w1b[...], xv, preferred_element_type=jnp.float32)   # tap 1
        lh = li + d
        hbuf[0:co, 0:d] = hb[:, 0:d]
        hbuf[0:co, d:li] = ha[:, 0:li - d] + hb[:, d:li]
        hbuf[0:co, li:lh] = ha[:, li - d:li]
        hv = jnp.maximum(hbuf[0:co, 0:lh] + s1[...], 0.0)                # (Co, Lh)

        # ---- conv2 + BN + ReLU ---------------------------------------------
        ga = jnp.dot(w2a[...], hv, preferred_element_type=jnp.float32)
        gb = jnp.dot(w2b[...], hv, preferred_element_type=jnp.float32)
        lg = lh + d
        if last:
            # Final level writes straight to the (lane-padded) HBM output.
            o_ref[:, 0:d] = jnp.maximum(gb[:, 0:d] + s2[...], 0.0)
            o_ref[:, d:lh] = jnp.maximum(
                ga[:, 0:lh - d] + gb[:, d:lh] + s2[...], 0.0)
            o_ref[:, lh:lg] = jnp.maximum(ga[:, lh - d:lh] + s2[...], 0.0)
            if lg < l_pad:
                o_ref[:, lg:l_pad] = jnp.zeros(
                    (o_ref.shape[0], l_pad - lg), jnp.float32)
        else:
            # Intermediate level output stays in VMEM (never touches HBM).
            xbuf[0:co, 0:d] = gb[:, 0:d]
            xbuf[0:co, d:lh] = ga[:, 0:lh - d] + gb[:, d:lh]
            xbuf[0:co, lh:lg] = ga[:, lh - d:lh]
            xv = jnp.maximum(xbuf[0:co, 0:lg] + s2[...], 0.0)
        li = lg


def temporal_conv_net_padded(x_ncl, prepared_params, dilations=None):
    """Full fused TCN forward.  x_ncl: (N, C, L) NCL as in PyTorch.

    Returns (out_padded, l_final): out_padded is (N, C_last, round_up(L_out,128))
    with the tail zero-filled (lane-dense stores); the true length is l_final.
    """
    N, cin0, l0 = x_ncl.shape
    num_levels = len(prepared_params)
    if dilations is None:
        dilations = tuple(2 ** i for i in range(num_levels))

    # Static per-level lengths (every conv grows the time axis by d).
    lengths_in = [l0]
    lengths_h = []
    for d in dilations:
        assert lengths_in[-1] > d, "time axis must exceed dilation per level"
        lh = lengths_in[-1] + d
        lengths_h.append(lh)
        lengths_in.append(lh + d)
    l_final = lengths_in[-1]
    l_pad = _round_up(l_final, 128)

    couts = [int(lp["w1a"].shape[0]) for lp in prepared_params]
    co_last = couts[-1]

    # Scratch sizing (one buffer reused by every level).
    c_h_max = max(couts)
    l_h_max = max(lengths_h)
    if num_levels > 1:
        c_x_max = max(couts[:-1])
        l_x_max = max(lengths_in[1:num_levels])
    else:
        c_x_max, l_x_max = 8, 128   # dummy, never touched

    # Flatten params and build specs: weights use constant index maps so they
    # are DMA'd once and stay resident across the batch grid.
    in_specs = [pl.BlockSpec((None, cin0, l0), lambda n: (n, 0, 0))]
    flat_params = []
    for lp in prepared_params:
        for name in ("w1a", "w1b", "s1", "w2a", "w2b", "s2"):
            arr = lp[name]
            in_specs.append(pl.BlockSpec(arr.shape, lambda n: (0, 0)))
            flat_params.append(arr)

    kernel = functools.partial(
        _tcn_fused_kernel, dilations=tuple(int(d) for d in dilations),
        l0=l0, l_pad=l_pad)

    out_padded = pl.pallas_call(
        kernel,
        out_shape=jax.ShapeDtypeStruct((N, co_last, l_pad), jnp.float32),
        grid_spec=pltpu.PrefetchScalarGridSpec(
            num_scalar_prefetch=0,
            grid=(N,),                                  # batch on parallel axis
            in_specs=in_specs,
            out_specs=pl.BlockSpec((None, co_last, l_pad),
                                   lambda n: (n, 0, 0)),
            scratch_shapes=[
                pltpu.VMEM((c_h_max, l_h_max), jnp.float32),   # conv1 outputs
                pltpu.VMEM((c_x_max, l_x_max), jnp.float32),   # level outputs
            ],
        ),
        compiler_params=pltpu.CompilerParams(
            dimension_semantics=("parallel",),
            # Raise v5e's 16 MiB scoped default; stays within v7x's 64 MiB.
            vmem_limit_bytes=64 * 1024 * 1024,
        ),
    )(x_ncl, *flat_params)
    return out_padded, l_final


def temporal_conv_net(x_ncl, prepared_params, dilations=None):
    """PyTorch-shaped result: (N, C_last, L_out) with the exact output length."""
    out_padded, l_final = temporal_conv_net_padded(x_ncl, prepared_params,
                                                   dilations)
    return out_padded[:, :, :l_final]


# ----------------------------------------------------------------------------
# One-time parameter preparation: fold BN into the conv weights/bias and split
# the 2-tap kernel into per-tap (Cout, Cin) matrices.
# ----------------------------------------------------------------------------
def prepare_tcn_params(raw_params):
    prepared = []
    for layer in raw_params:
        lp = {}
        for conv_idx, tag in ((0, "1"), (1, "2")):
            w = layer[f"w{conv_idx}"]                     # (Cout, Cin, 2) torch OIW
            b = layer[f"b{conv_idx}"]
            scale = layer[f"gamma{conv_idx}"] / jnp.sqrt(
                layer[f"rvar{conv_idx}"] + BN_EPS)
            wf = (w * scale[:, None, None]).astype(jnp.float32)
            lp[f"w{tag}a"] = wf[:, :, 0]                  # tap 0
            lp[f"w{tag}b"] = wf[:, :, 1]                  # tap 1 (offset d)
            lp[f"s{tag}"] = (((b - layer[f"rmean{conv_idx}"]) * scale
                              + layer[f"beta{conv_idx}"])
                             .reshape(-1, 1).astype(jnp.float32))
        prepared.append(lp)
    return prepared


# ----------------------------------------------------------------------------
# Synthetic parameters + pure-JAX reference (PyTorch semantics).
# ----------------------------------------------------------------------------
def init_tcn_params(key, num_inputs, num_channels):
    params = []
    for i, out_ch in enumerate(num_channels):
        in_ch = num_inputs if i == 0 else num_channels[i - 1]
        layer = {}
        for conv_idx, (ci, co) in enumerate([(in_ch, out_ch), (out_ch, out_ch)]):
            key, k_w, k_b = jax.random.split(key, 3)
            fan_in = ci * KERNEL_SIZE
            bound = 1.0 / np.sqrt(fan_in)
            layer[f"w{conv_idx}"] = jax.random.uniform(
                k_w, (co, ci, KERNEL_SIZE), jnp.float32, -bound, bound)
            layer[f"b{conv_idx}"] = jax.random.uniform(
                k_b, (co,), jnp.float32, -bound, bound)
            # BatchNorm1d defaults: gamma=1, beta=0, running_mean=0, running_var=1
            layer[f"gamma{conv_idx}"] = jnp.ones((co,), jnp.float32)
            layer[f"beta{conv_idx}"] = jnp.zeros((co,), jnp.float32)
            layer[f"rmean{conv_idx}"] = jnp.zeros((co,), jnp.float32)
            layer[f"rvar{conv_idx}"] = jnp.ones((co,), jnp.float32)
        params.append(layer)
    return params


def temporal_conv_net_reference(x_ncl, params):
    x = x_ncl
    for i, layer in enumerate(params):
        d = 2 ** i
        pad = (KERNEL_SIZE - 1) * d
        for conv_idx in range(2):
            w = layer[f"w{conv_idx}"]
            b = layer[f"b{conv_idx}"]
            z = jax.lax.conv_general_dilated(
                x, w, window_strides=(1,), padding=[(pad, pad)],
                rhs_dilation=(d,), dimension_numbers=("NCH", "OIH", "NCH"))
            z = z + b[None, :, None]
            scale = layer[f"gamma{conv_idx}"] / jnp.sqrt(
                layer[f"rvar{conv_idx}"] + BN_EPS)
            z = (z - layer[f"rmean{conv_idx}"][None, :, None]) * scale[None, :, None] \
                + layer[f"beta{conv_idx}"][None, :, None]
            x = jnp.maximum(z, 0.0)                       # Dropout: identity (eval)
    return x


if __name__ == "__main__":
    # Small shapes: batch=2, num_inputs=4, seq_len=16, num_channels=[8, 16]
    batch, num_inputs, seq_len = 2, 4, 16
    num_channels = [8, 16]

    key = jax.random.PRNGKey(0)
    key, k_x = jax.random.split(key)
    x = jax.random.normal(k_x, (batch, num_inputs, seq_len), jnp.float32)

    raw_params = init_tcn_params(key, num_inputs, num_channels)
    prepared = prepare_tcn_params(raw_params)   # one-time BN folding / weight split

    out = temporal_conv_net(x, prepared)
    out = jax.block_until_ready(out)

    ref = jax.block_until_ready(temporal_conv_net_reference(x, raw_params))
    np.testing.assert_allclose(np.asarray(out), np.asarray(ref),
                               rtol=1e-5, atol=1e-5)

    print("KERNEL_OK")
</pallas_src>

<mosaic_0001>
module attributes {stable_mosaic.version = 11 : i64} {
  func.func @_tcn_fused_kernel(%arg0: i32, %arg1: memref<1x4x16xf32, #tpu.memory_space<vmem>>, %arg2: memref<8x4xf32, #tpu.memory_space<vmem>>, %arg3: memref<8x4xf32, #tpu.memory_space<vmem>>, %arg4: memref<8x1xf32, #tpu.memory_space<vmem>>, %arg5: memref<8x8xf32, #tpu.memory_space<vmem>>, %arg6: memref<8x8xf32, #tpu.memory_space<vmem>>, %arg7: memref<8x1xf32, #tpu.memory_space<vmem>>, %arg8: memref<16x8xf32, #tpu.memory_space<vmem>>, %arg9: memref<16x8xf32, #tpu.memory_space<vmem>>, %arg10: memref<16x1xf32, #tpu.memory_space<vmem>>, %arg11: memref<16x16xf32, #tpu.memory_space<vmem>>, %arg12: memref<16x16xf32, #tpu.memory_space<vmem>>, %arg13: memref<16x1xf32, #tpu.memory_space<vmem>>, %arg14: memref<1x16x128xf32, #tpu.memory_space<vmem>>, %arg15: memref<16x20xf32, #tpu.memory_space<vmem>>, %arg16: memref<8x18xf32, #tpu.memory_space<vmem>>) attributes {dimension_semantics = [#tpu.dimension_semantics<parallel>], iteration_bounds = array<i64: 2>, scalar_prefetch = 0 : i64, scratch_operands = 2 : i64, tpu.core_type = #tpu.core_type<tc>, window_params = [{transform_indices = @transform_0, window_bounds = array<i64: 1, 4, 16>}, {pipeline_mode = #tpu.pipeline_mode<synchronous>, transform_indices = @transform_1, window_bounds = array<i64: 8, 4>}, {pipeline_mode = #tpu.pipeline_mode<synchronous>, transform_indices = @transform_2, window_bounds = array<i64: 8, 4>}, {pipeline_mode = #tpu.pipeline_mode<synchronous>, transform_indices = @transform_3, window_bounds = array<i64: 8, 1>}, {pipeline_mode = #tpu.pipeline_mode<synchronous>, transform_indices = @transform_4, window_bounds = array<i64: 8, 8>}, {pipeline_mode = #tpu.pipeline_mode<synchronous>, transform_indices = @transform_5, window_bounds = array<i64: 8, 8>}, {pipeline_mode = #tpu.pipeline_mode<synchronous>, transform_indices = @transform_6, window_bounds = array<i64: 8, 1>}, {pipeline_mode = #tpu.pipeline_mode<synchronous>, transform_indices = @transform_7, window_bounds = array<i64: 16, 8>}, {pipeline_mode = #tpu.pipeline_mode<synchronous>, transform_indices = @transform_8, window_bounds = array<i64: 16, 8>}, {pipeline_mode = #tpu.pipeline_mode<synchronous>, transform_indices = @transform_9, window_bounds = array<i64: 16, 1>}, {pipeline_mode = #tpu.pipeline_mode<synchronous>, transform_indices = @transform_10, window_bounds = array<i64: 16, 16>}, {pipeline_mode = #tpu.pipeline_mode<synchronous>, transform_indices = @transform_11, window_bounds = array<i64: 16, 16>}, {pipeline_mode = #tpu.pipeline_mode<synchronous>, transform_indices = @transform_12, window_bounds = array<i64: 16, 1>}, {transform_indices = @transform_13, window_bounds = array<i64: 1, 16, 128>}]} {
    %c0 = arith.constant 0 : index
    %c0_0 = arith.constant 0 : index
    %c0_1 = arith.constant 0 : index
    %0 = vector.load %arg1[%c0, %c0_0, %c0_1] : memref<1x4x16xf32, #tpu.memory_space<vmem>>, vector<1x4x16xf32>
    %1 = vector.shape_cast %0 : vector<1x4x16xf32> to vector<4x16xf32>
    %c0_2 = arith.constant 0 : index
    %c0_3 = arith.constant 0 : index
    %2 = vector.load %arg2[%c0_2, %c0_3] : memref<8x4xf32, #tpu.memory_space<vmem>>, vector<8x4xf32>
    %cst = arith.constant dense<0.000000e+00> : vector<8x16xf32>
    %3 = tpu.matmul %2, %1, %cst {dimension_numbers = #tpu.dot_dimension_numbers<[1], [0], [0], [1], [0, 0, 1, 1], [], []>} : vector<8x4xf32>, vector<4x16xf32>, vector<8x16xf32> -> vector<8x16xf32>
    %c0_4 = arith.constant 0 : index
    %c0_5 = arith.constant 0 : index
    %4 = vector.load %arg3[%c0_4, %c0_5] : memref<8x4xf32, #tpu.memory_space<vmem>>, vector<8x4xf32>
    %cst_6 = arith.constant dense<0.000000e+00> : vector<8x16xf32>
    %5 = tpu.matmul %4, %1, %cst_6 {dimension_numbers = #tpu.dot_dimension_numbers<[1], [0], [0], [1], [0, 0, 1, 1], [], []>} : vector<8x4xf32>, vector<4x16xf32>, vector<8x16xf32> -> vector<8x16xf32>
    %6 = vector.extract_strided_slice %5 {offsets = [0, 0], sizes = [8, 1], strides = [1, 1]} : vector<8x16xf32> to vector<8x1xf32>
    %c0_7 = arith.constant 0 : index
    %c0_8 = arith.constant 0 : index
    %7 = vector.load %arg15[%c0_7, %c0_8] : memref<16x20xf32, #tpu.memory_space<vmem>>, vector<8x1xf32>
    tpu.vector_store %arg15[%c0_7, %c0_8], %6 {strides = array<i32>} : memref<16x20xf32, #tpu.memory_space<vmem>>, vector<8x1xf32>,
    %8 = vector.extract_strided_slice %3 {offsets = [0, 0], sizes = [8, 15], strides = [1, 1]} : vector<8x16xf32> to vector<8x15xf32>
    %9 = vector.extract_strided_slice %5 {offsets = [0, 1], sizes = [8, 15], strides = [1, 1]} : vector<8x16xf32> to vector<8x15xf32>
    %10 = arith.addf %8, %9 : vector<8x15xf32>
    %c0_9 = arith.constant 0 : index
    %c1 = arith.constant 1 : index
    %11 = vector.load %arg15[%c0_9, %c1] : memref<16x20xf32, #tpu.memory_space<vmem>>, vector<8x15xf32>
    tpu.vector_store %arg15[%c0_9, %c1], %10 {strides = array<i32>} : memref<16x20xf32, #tpu.memory_space<vmem>>, vector<8x15xf32>,
    %12 = vector.extract_strided_slice %3 {offsets = [0, 15], sizes = [8, 1], strides = [1, 1]} : vector<8x16xf32> to vector<8x1xf32>
    %c0_10 = arith.constant 0 : index
    %c16 = arith.constant 16 : index
    %13 = vector.load %arg15[%c0_10, %c16] : memref<16x20xf32, #tpu.memory_space<vmem>>, vector<8x1xf32>
    tpu.vector_store %arg15[%c0_10, %c16], %12 {strides = array<i32>} : memref<16x20xf32, #tpu.memory_space<vmem>>, vector<8x1xf32>,
    %c0_11 = arith.constant 0 : index
    %c0_12 = arith.constant 0 : index
    %14 = vector.load %arg15[%c0_11, %c0_12] : memref<16x20xf32, #tpu.memory_space<vmem>>, vector<8x17xf32>
    %c0_13 = arith.constant 0 : index
    %c0_14 = arith.constant 0 : index
    %15 = vector.load %arg4[%c0_13, %c0_14] : memref<8x1xf32, #tpu.memory_space<vmem>>, vector<8x1xf32>
    %16 = vector.broadcast %15 : vector<8x1xf32> to vector<8x17xf32>
    %17 = arith.addf %14, %16 : vector<8x17xf32>
    %cst_15 = arith.constant 0.000000e+00 : f32
    %18 = vector.broadcast %cst_15 : f32 to vector<8x17xf32>
    %19 = arith.maximumf %17, %18 : vector<8x17xf32>
    %c0_16 = arith.constant 0 : index
    %c0_17 = arith.constant 0 : index
    %20 = vector.load %arg5[%c0_16, %c0_17] : memref<8x8xf32, #tpu.memory_space<vmem>>, vector<8x8xf32>
    %cst_18 = arith.constant dense<0.000000e+00> : vector<8x17xf32>
    %21 = tpu.matmul %20, %19, %cst_18 {dimension_numbers = #tpu.dot_dimension_numbers<[1], [0], [0], [1], [0, 0, 1, 1], [], []>} : vector<8x8xf32>, vector<8x17xf32>, vector<8x17xf32> -> vector<8x17xf32>
    %c0_19 = arith.constant 0 : index
    %c0_20 = arith.constant 0 : index
    %22 = vector.load %arg6[%c0_19, %c0_20] : memref<8x8xf32, #tpu.memory_space<vmem>>, vector<8x8xf32>
    %cst_21 = arith.constant dense<0.000000e+00> : vector<8x17xf32>
    %23 = tpu.matmul %22, %19, %cst_21 {dimension_numbers = #tpu.dot_dimension_numbers<[1], [0], [0], [1], [0, 0, 1, 1], [], []>} : vector<8x8xf32>, vector<8x17xf32>, vector<8x17xf32> -> vector<8x17xf32>
    %24 = vector.extract_strided_slice %23 {offsets = [0, 0], sizes = [8, 1], strides = [1, 1]} : vector<8x17xf32> to vector<8x1xf32>
    %c0_22 = arith.constant 0 : index
    %c0_23 = arith.constant 0 : index
    %25 = vector.load %arg16[%c0_22, %c0_23] : memref<8x18xf32, #tpu.memory_space<vmem>>, vector<8x1xf32>
    tpu.vector_store %arg16[%c0_22, %c0_23], %24 {strides = array<i32>} : memref<8x18xf32, #tpu.memory_space<vmem>>, vector<8x1xf32>,
    %26 = vector.extract_strided_slice %21 {offsets = [0, 0], sizes = [8, 16], strides = [1, 1]} : vector<8x17xf32> to vector<8x16xf32>
    %27 = vector.extract_strided_slice %23 {offsets = [0, 1], sizes = [8, 16], strides = [1, 1]} : vector<8x17xf32> to vector<8x16xf32>
    %28 = arith.addf %26, %27 : vector<8x16xf32>
    %c0_24 = arith.constant 0 : index
    %c1_25 = arith.constant 1 : index
    %29 = vector.load %arg16[%c0_24, %c1_25] : memref<8x18xf32, #tpu.memory_space<vmem>>, vector<8x16xf32>
    tpu.vector_store %arg16[%c0_24, %c1_25], %28 {strides = array<i32>} : memref<8x18xf32, #tpu.memory_space<vmem>>, vector<8x16xf32>,
    %30 = vector.extract_strided_slice %21 {offsets = [0, 16], sizes = [8, 1], strides = [1, 1]} : vector<8x17xf32> to vector<8x1xf32>
    %c0_26 = arith.constant 0 : index
    %c17 = arith.constant 17 : index
    %31 = vector.load %arg16[%c0_26, %c17] : memref<8x18xf32, #tpu.memory_space<vmem>>, vector<8x1xf32>
    tpu.vector_store %arg16[%c0_26, %c17], %30 {strides = array<i32>} : memref<8x18xf32, #tpu.memory_space<vmem>>, vector<8x1xf32>,
    %c0_27 = arith.constant 0 : index
    %c0_28 = arith.constant 0 : index
    %32 = vector.load %arg16[%c0_27, %c0_28] : memref<8x18xf32, #tpu.memory_space<vmem>>, vector<8x18xf32>
    %c0_29 = arith.constant 0 : index
    %c0_30 = arith.constant 0 : index
    %33 = vector.load %arg7[%c0_29, %c0_30] : memref<8x1xf32, #tpu.memory_space<vmem>>, vector<8x1xf32>
    %34 = vector.broadcast %33 : vector<8x1xf32> to vector<8x18xf32>
    %35 = arith.addf %32, %34 : vector<8x18xf32>
    %cst_31 = arith.constant 0.000000e+00 : f32
    %36 = vector.broadcast %cst_31 : f32 to vector<8x18xf32>
    %37 = arith.maximumf %35, %36 : vector<8x18xf32>
    %c0_32 = arith.constant 0 : index
    %c0_33 = arith.constant 0 : index
    %38 = vector.load %arg8[%c0_32, %c0_33] : memref<16x8xf32, #tpu.memory_space<vmem>>, vector<16x8xf32>
    %cst_34 = arith.constant dense<0.000000e+00> : vector<16x18xf32>
    %39 = tpu.matmul %38, %37, %cst_34 {dimension_numbers = #tpu.dot_dimension_numbers<[1], [0], [0], [1], [0, 0, 1, 1], [], []>} : vector<16x8xf32>, vector<8x18xf32>, vector<16x18xf32> -> vector<16x18xf32>
    %c0_35 = arith.constant 0 : index
    %c0_36 = arith.constant 0 : index
    %40 = vector.load %arg9[%c0_35, %c0_36] : memref<16x8xf32, #tpu.memory_space<vmem>>, vector<16x8xf32>
    %cst_37 = arith.constant dense<0.000000e+00> : vector<16x18xf32>
    %41 = tpu.matmul %40, %37, %cst_37 {dimension_numbers = #tpu.dot_dimension_numbers<[1], [0], [0], [1], [0, 0, 1, 1], [], []>} : vector<16x8xf32>, vector<8x18xf32>, vector<16x18xf32> -> vector<16x18xf32>
    %42 = vector.extract_strided_slice %41 {offsets = [0, 0], sizes = [16, 2], strides = [1, 1]} : vector<16x18xf32> to vector<16x2xf32>
    %c0_38 = arith.constant 0 : index
    %c0_39 = arith.constant 0 : index
    %43 = vector.load %arg15[%c0_38, %c0_39] : memref<16x20xf32, #tpu.memory_space<vmem>>, vector<16x2xf32>
    tpu.vector_store %arg15[%c0_38, %c0_39], %42 {strides = array<i32>} : memref<16x20xf32, #tpu.memory_space<vmem>>, vector<16x2xf32>,
    %44 = vector.extract_strided_slice %39 {offsets = [0, 0], sizes = [16, 16], strides = [1, 1]} : vector<16x18xf32> to vector<16x16xf32>
    %45 = vector.extract_strided_slice %41 {offsets = [0, 2], sizes = [16, 16], strides = [1, 1]} : vector<16x18xf32> to vector<16x16xf32>
    %46 = arith.addf %44, %45 : vector<16x16xf32>
    %c0_40 = arith.constant 0 : index
    %c2 = arith.constant 2 : index
    %47 = vector.load %arg15[%c0_40, %c2] : memref<16x20xf32, #tpu.memory_space<vmem>>, vector<16x16xf32>
    tpu.vector_store %arg15[%c0_40, %c2], %46 {strides = array<i32>} : memref<16x20xf32, #tpu.memory_space<vmem>>, vector<16x16xf32>,
    %48 = vector.extract_strided_slice %39 {offsets = [0, 16], sizes = [16, 2], strides = [1, 1]} : vector<16x18xf32> to vector<16x2xf32>
    %c0_41 = arith.constant 0 : index
    %c18 = arith.constant 18 : index
    %49 = vector.load %arg15[%c0_41, %c18] : memref<16x20xf32, #tpu.memory_space<vmem>>, vector<16x2xf32>
    tpu.vector_store %arg15[%c0_41, %c18], %48 {strides = array<i32>} : memref<16x20xf32, #tpu.memory_space<vmem>>, vector<16x2xf32>,
    %c0_42 = arith.constant 0 : index
    %c0_43 = arith.constant 0 : index
    %50 = vector.load %arg15[%c0_42, %c0_43] : memref<16x20xf32, #tpu.memory_space<vmem>>, vector<16x20xf32>
    %c0_44 = arith.constant 0 : index
    %c0_45 = arith.constant 0 : index
    %51 = vector.load %arg10[%c0_44, %c0_45] : memref<16x1xf32, #tpu.memory_space<vmem>>, vector<16x1xf32>
    %52 = vector.broadcast %51 : vector<16x1xf32> to vector<16x20xf32>
    %53 = arith.addf %50, %52 : vector<16x20xf32>
    %cst_46 = arith.constant 0.000000e+00 : f32
    %54 = vector.broadcast %cst_46 : f32 to vector<16x20xf32>
    %55 = arith.maximumf %53, %54 : vector<16x20xf32>
    %c0_47 = arith.constant 0 : index
    %c0_48 = arith.constant 0 : index
    %56 = vector.load %arg11[%c0_47, %c0_48] : memref<16x16xf32, #tpu.memory_space<vmem>>, vector<16x16xf32>
    %cst_49 = arith.constant dense<0.000000e+00> : vector<16x20xf32>
    %57 = tpu.matmul %56, %55, %cst_49 {dimension_numbers = #tpu.dot_dimension_numbers<[1], [0], [0], [1], [0, 0, 1, 1], [], []>} : vector<16x16xf32>, vector<16x20xf32>, vector<16x20xf32> -> vector<16x20xf32>
    %c0_50 = arith.constant 0 : index
    %c0_51 = arith.constant 0 : index
    %58 = vector.load %arg12[%c0_50, %c0_51] : memref<16x16xf32, #tpu.memory_space<vmem>>, vector<16x16xf32>
    %cst_52 = arith.constant dense<0.000000e+00> : vector<16x20xf32>
    %59 = tpu.matmul %58, %55, %cst_52 {dimension_numbers = #tpu.dot_dimension_numbers<[1], [0], [0], [1], [0, 0, 1, 1], [], []>} : vector<16x16xf32>, vector<16x20xf32>, vector<16x20xf32> -> vector<16x20xf32>
    %60 = vector.extract_strided_slice %59 {offsets = [0, 0], sizes = [16, 2], strides = [1, 1]} : vector<16x20xf32> to vector<16x2xf32>
    %c0_53 = arith.constant 0 : index
    %c0_54 = arith.constant 0 : index
    %61 = vector.load %arg13[%c0_53, %c0_54] : memref<16x1xf32, #tpu.memory_space<vmem>>, vector<16x1xf32>
    %62 = vector.broadcast %61 : vector<16x1xf32> to vector<16x2xf32>
    %63 = arith.addf %60, %62 : vector<16x2xf32>
    %cst_55 = arith.constant 0.000000e+00 : f32
    %64 = vector.broadcast %cst_55 : f32 to vector<16x2xf32>
    %65 = arith.maximumf %63, %64 : vector<16x2xf32>
    %c0_56 = arith.constant 0 : index
    %c0_57 = arith.constant 0 : index
    %c0_58 = arith.constant 0 : index
    %66 = vector.load %arg14[%c0_56, %c0_57, %c0_58] : memref<1x16x128xf32, #tpu.memory_space<vmem>>, vector<1x16x2xf32>
    %67 = vector.shape_cast %66 : vector<1x16x2xf32> to vector<16x2xf32>
    %68 = vector.shape_cast %65 : vector<16x2xf32> to vector<1x16x2xf32>
    tpu.vector_store %arg14[%c0_56, %c0_57, %c0_58], %68 {strides = array<i32>} : memref<1x16x128xf32, #tpu.memory_space<vmem>>, vector<1x16x2xf32>,
    %69 = vector.extract_strided_slice %57 {offsets = [0, 0], sizes = [16, 18], strides = [1, 1]} : vector<16x20xf32> to vector<16x18xf32>
    %70 = vector.extract_strided_slice %59 {offsets = [0, 2], sizes = [16, 18], strides = [1, 1]} : vector<16x20xf32> to vector<16x18xf32>
    %71 = arith.addf %69, %70 : vector<16x18xf32>
    %c0_59 = arith.constant 0 : index
    %c0_60 = arith.constant 0 : index
    %72 = vector.load %arg13[%c0_59, %c0_60] : memref<16x1xf32, #tpu.memory_space<vmem>>, vector<16x1xf32>
    %73 = vector.broadcast %72 : vector<16x1xf32> to vector<16x18xf32>
    %74 = arith.addf %71, %73 : vector<16x18xf32>
    %cst_61 = arith.constant 0.000000e+00 : f32
    %75 = vector.broadcast %cst_61 : f32 to vector<16x18xf32>
    %76 = arith.maximumf %74, %75 : vector<16x18xf32>
    %c0_62 = arith.constant 0 : index
    %c0_63 = arith.constant 0 : index
    %c2_64 = arith.constant 2 : index
    %77 = vector.load %arg14[%c0_62, %c0_63, %c2_64] : memref<1x16x128xf32, #tpu.memory_space<vmem>>, vector<1x16x18xf32>
    %78 = vector.shape_cast %77 : vector<1x16x18xf32> to vector<16x18xf32>
    %79 = vector.shape_cast %76 : vector<16x18xf32> to vector<1x16x18xf32>
    tpu.vector_store %arg14[%c0_62, %c0_63, %c2_64], %79 {strides = array<i32>} : memref<1x16x128xf32, #tpu.memory_space<vmem>>, vector<1x16x18xf32>,
    %80 = vector.extract_strided_slice %57 {offsets = [0, 18], sizes = [16, 2], strides = [1, 1]} : vector<16x20xf32> to vector<16x2xf32>
    %c0_65 = arith.constant 0 : index
    %c0_66 = arith.constant 0 : index
    %81 = vector.load %arg13[%c0_65, %c0_66] : memref<16x1xf32, #tpu.memory_space<vmem>>, vector<16x1xf32>
    %82 = vector.broadcast %81 : vector<16x1xf32> to vector<16x2xf32>
    %83 = arith.addf %80, %82 : vector<16x2xf32>
    %cst_67 = arith.constant 0.000000e+00 : f32
    %84 = vector.broadcast %cst_67 : f32 to vector<16x2xf32>
    %85 = arith.maximumf %83, %84 : vector<16x2xf32>
    %c0_68 = arith.constant 0 : index
    %c0_69 = arith.constant 0 : index
    %c20 = arith.constant 20 : index
    %86 = vector.load %arg14[%c0_68, %c0_69, %c20] : memref<1x16x128xf32, #tpu.memory_space<vmem>>, vector<1x16x2xf32>
    %87 = vector.shape_cast %86 : vector<1x16x2xf32> to vector<16x2xf32>
    %88 = vector.shape_cast %85 : vector<16x2xf32> to vector<1x16x2xf32>
    tpu.vector_store %arg14[%c0_68, %c0_69, %c20], %88 {strides = array<i32>} : memref<1x16x128xf32, #tpu.memory_space<vmem>>, vector<1x16x2xf32>,
    %cst_70 = arith.constant 0.000000e+00 : f32
    %89 = vector.broadcast %cst_70 : f32 to vector<16x106xf32>
    %c0_71 = arith.constant 0 : index
    %c0_72 = arith.constant 0 : index
    %c22 = arith.constant 22 : index
    %90 = vector.load %arg14[%c0_71, %c0_72, %c22] : memref<1x16x128xf32, #tpu.memory_space<vmem>>, vector<1x16x106xf32>
    %91 = vector.shape_cast %90 : vector<1x16x106xf32> to vector<16x106xf32>
    %92 = vector.shape_cast %89 : vector<16x106xf32> to vector<1x16x106xf32>
    tpu.vector_store %arg14[%c0_71, %c0_72, %c22], %92 {strides = array<i32>} : memref<1x16x128xf32, #tpu.memory_space<vmem>>, vector<1x16x106xf32>,
    return
  }
  func.func @transform_0(%arg0: i32) -> (i32, i32, i32) {
    %c0_i32 = arith.constant 0 : i32
    %c0_i32_0 = arith.constant 0 : i32
    %c0_i32_1 = arith.constant 0 : i32
    return %arg0, %c0_i32, %c0_i32_0 : i32, i32, i32
  }
  func.func @transform_1(%arg0: i32) -> (i32, i32) {
    %c0_i32 = arith.constant 0 : i32
    %c0_i32_0 = arith.constant 0 : i32
    %c0_i32_1 = arith.constant 0 : i32
    return %c0_i32, %c0_i32_0 : i32, i32
  }
  func.func @transform_2(%arg0: i32) -> (i32, i32) {
    %c0_i32 = arith.constant 0 : i32
    %c0_i32_0 = arith.constant 0 : i32
    %c0_i32_1 = arith.constant 0 : i32
    return %c0_i32, %c0_i32_0 : i32, i32
  }
  func.func @transform_3(%arg0: i32) -> (i32, i32) {
    %c0_i32 = arith.constant 0 : i32
    %c0_i32_0 = arith.constant 0 : i32
    %c0_i32_1 = arith.constant 0 : i32
    return %c0_i32, %c0_i32_0 : i32, i32
  }
  func.func @transform_4(%arg0: i32) -> (i32, i32) {
    %c0_i32 = arith.constant 0 : i32
    %c0_i32_0 = arith.constant 0 : i32
    %c0_i32_1 = arith.constant 0 : i32
    return %c0_i32, %c0_i32_0 : i32, i32
  }
  func.func @transform_5(%arg0: i32) -> (i32, i32) {
    %c0_i32 = arith.constant 0 : i32
    %c0_i32_0 = arith.constant 0 : i32
    %c0_i32_1 = arith.constant 0 : i32
    return %c0_i32, %c0_i32_0 : i32, i32
  }
  func.func @transform_6(%arg0: i32) -> (i32, i32) {
    %c0_i32 = arith.constant 0 : i32
    %c0_i32_0 = arith.constant 0 : i32
    %c0_i32_1 = arith.constant 0 : i32
    return %c0_i32, %c0_i32_0 : i32, i32
  }
  func.func @transform_7(%arg0: i32) -> (i32, i32) {
    %c0_i32 = arith.constant 0 : i32
    %c0_i32_0 = arith.constant 0 : i32
    %c0_i32_1 = arith.constant 0 : i32
    return %c0_i32, %c0_i32_0 : i32, i32
  }
  func.func @transform_8(%arg0: i32) -> (i32, i32) {
    %c0_i32 = arith.constant 0 : i32
    %c0_i32_0 = arith.constant 0 : i32
    %c0_i32_1 = arith.constant 0 : i32
    return %c0_i32, %c0_i32_0 : i32, i32
  }
  func.func @transform_9(%arg0: i32) -> (i32, i32) {
    %c0_i32 = arith.constant 0 : i32
    %c0_i32_0 = arith.constant 0 : i32
    %c0_i32_1 = arith.constant 0 : i32
    return %c0_i32, %c0_i32_0 : i32, i32
  }
  func.func @transform_10(%arg0: i32) -> (i32, i32) {
    %c0_i32 = arith.constant 0 : i32
    %c0_i32_0 = arith.constant 0 : i32
    %c0_i32_1 = arith.constant 0 : i32
    return %c0_i32, %c0_i32_0 : i32, i32
  }
  func.func @transform_11(%arg0: i32) -> (i32, i32) {
    %c0_i32 = arith.constant 0 : i32
    %c0_i32_0 = arith.constant 0 : i32
    %c0_i32_1 = arith.constant 0 : i32
    return %c0_i32, %c0_i32_0 : i32, i32
  }
  func.func @transform_12(%arg0: i32) -> (i32, i32) {
    %c0_i32 = arith.constant 0 : i32
    %c0_i32_0 = arith.constant 0 : i32
    %c0_i32_1 = arith.constant 0 : i32
    return %c0_i32, %c0_i32_0 : i32, i32
  }
  func.func @transform_13(%arg0: i32) -> (i32, i32, i32) {
    %c0_i32 = arith.constant 0 : i32
    %c0_i32_0 = arith.constant 0 : i32
    %c0_i32_1 = arith.constant 0 : i32
    return %arg0, %c0_i32, %c0_i32_0 : i32, i32, i32
  }
}

</mosaic_0001>

<bundles_post_ra>
// kernel: tpu_custom_call.1
= control target key start
LH: loop header
LB: loop body
LE: loop exit
PB: predicated region body
PF: predicated region fallthrough
CT: control target
= control target key end

     0   :  { %s3047_s0 = inlined_call_operand.hbm [shape: f32[2,4,16], index: 0, kind: input, shape index: {}]   ;;  %s3048_s1 = inlined_call_operand.hbm [shape: f32[8,4], index: 1, kind: input, shape index: {}]   ;;  %s3049_s2 = inlined_call_operand.hbm [shape: f32[8,4], index: 2, kind: input, shape index: {}]   ;;  %s3050_s3 = inlined_call_operand.hbm [shape: f32[8,1], index: 3, kind: input, shape index: {}]   ;;  %s3051_s4 = inlined_call_operand.hbm [shape: f32[8,8], index: 4, kind: input, shape index: {}]   ;;  %s3052_s5 = inlined_call_operand.hbm [shape: f32[8,8], index: 5, kind: input, shape index: {}]   ;;  %s3053_s6 = inlined_call_operand.hbm [shape: f32[8,1], index: 6, kind: input, shape index: {}]   ;;  %s3054_s7 = inlined_call_operand.hbm [shape: f32[16,8], index: 7, kind: input, shape index: {}]   ;;  %s3055_s8 = inlined_call_operand.hbm [shape: f32[16,8], index: 8, kind: input, shape index: {}]   ;;  %s3056_s9 = inlined_call_operand.hbm [shape: f32[16,1], index: 9, kind: input, shape index: {}]   ;;  %s3057_s10 = inlined_call_operand.hbm [shape: f32[16,16], index: 10, kind: input, shape index: {}]   ;;  %s3058_s11 = inlined_call_operand.hbm [shape: f32[16,16], index: 11, kind: input, shape index: {}]   ;;  %s3059_s12 = inlined_call_operand.hbm [shape: f32[16,1], index: 12, kind: input, shape index: {}]   ;;  %s3060_s13 = inlined_call_operand.hbm [shape: f32[2,16,128], index: 13, kind: output, shape index: {}]  }
   0x1   :  { %3070 = sst [smem:[#allocation36_spill]] %s3047_s0 }
   0x2   :  { %3071 = sst [smem:[#allocation37_spill]] %s3048_s1 }
   0x3   :  { %3072 = sst [smem:[#allocation38_spill]] %s3049_s2 }
   0x4   :  { %3073 = sst [smem:[#allocation39_spill]] %s3050_s3 }
   0x5   :  { %3074 = sst [smem:[#allocation40_spill]] %s3060_s13 }
   0x6   :  { %18 = vsyncpa [#allocation5], 0 }
   0x7   :  { %20 = vsyncpa [#allocation5 + $0x1], 0 }
   0x8   :  { %21 = vsyncpa [#allocation8], 0 }
   0x9   :  { %22 = vsyncpa [#allocation11], 0 }
   0xa   :  { %23 = vsyncpa [#allocation14], 0 }
   0xb   :  { %24 = vsyncpa [#allocation17], 0 }
   0xc   :  { %25 = vsyncpa [#allocation20], 0 }
   0xd   :  { %26 = vsyncpa [#allocation23], 0 }
   0xe   :  { %27 = vsyncpa [#allocation6], 0 }
   0xf   :  { %29 = vsyncpa [#allocation6 + $0x1], 0  ;;  %s2507_s25 = smov 0   ;;  %s2509_s26 = smov 0  }
  0x10   :  { %s2511_s27 = smov 0   ;;  %s2513_s28 = smov 0  }
  0x11 LB: > { %s2412_s29 = smov [#allocation7]   ;;  %s2528_s14 = sadd.s32 4294967295, %s2410_s28   ;;  %s2410_s28 = sphi %s2513_s28, %s3113_s28   ;;  %s2406_s27 = sphi %s2511_s27, %s3112_s27   ;;  %s2402_s26 = sphi %s2509_s26, %s3111_s26   ;;  %s2398_s25 = sphi %s2507_s25, %s3110_s25  }
  0x12   : > { %s357_s30 = sshll.u32 %s2412_s29, 4  ;;  %3075 = sst [smem:[#allocation34_spill]] %s2528_s14  ;;  %s2533_s30 = int_to_ptr.vmem [resolvable:$true] %s357_s30 }
  0x13   : > { %p1649_p0 = scmp.ge.s32.totalorder %s2410_s28, 1  ;;  %p3067_p1 = scmp.eq.s32.totalorder %s2528_s14, 0 }
  0x14   : > { %p344_p2 = scmp.lt.s32.totalorder %s2410_s28, 3  ;;  %s2413_s16 = smov [#allocation10]  }
  0x15   : > { %s379_s17 = sshll.u32 %s2413_s16, 4  ;;  %s2414_s18 = smov [#allocation13]   ;;  %s2542_s17 = int_to_ptr.vmem [resolvable:$true] %s379_s17 }
  0x16   : > { %p2535_p3 = pnand %p1649_p0, %p344_p2  ;;  %s401_s19 = sshll.u32 %s2414_s18, 4  ;;  %s2550_s19 = int_to_ptr.vmem [resolvable:$true] %s401_s19 }
  0x17   : > { %s2415_s21 = smov [#allocation16]   ;;  %s3079_s1 = sld [smem:[#allocation37_spill]] }
  0x18   : > { %s3076_s15 = scalar_select %p2535_p3, 1, 0 }
  0x19   : > { %p1826_p5 = pneg %p2535_p3  ;;  %s2552_s22 = sshll.u32 %s2415_s21, 4  ;;  %s423_s22 = int_to_ptr.vmem [resolvable:$true] %s2552_s22 }
  0x1a   : > { %3077 = sst [smem:[#allocation35_spill]] %s3076_s15 }
  0x1b   : > { %p2546_p6 = pnand %p1826_p5, %p3067_p1 }
  0x1d   : > { %s1954_s29 = scalar_lea.hbm %s3079_s1, 128  ;;  %p2562_p8 = pneg %p2546_p6 }
  0x1e   : > { %p1955_p7 = scmp.ne.s32.totalorder %s3079_s1, %s1954_s29  ;;  %p1961_p11 = scmp.lt.u32.totalorder %s1954_s29, %s3079_s1 }
  0x20   : > { %p1957_p9 = pnand %p2562_p8, %p1955_p7 }
  0x22   : > { %p1958_p10 = pneg %p1957_p9 }
  0x24   : > { %p1963_p12 = pnand %p1961_p11, %p1958_p10 }
  0x26   : > { %1966 = shalt.err (!%p1963_p12)
}
  0x27   : > { %s1967_s13 = scalar_lea.vmem %s2533_s30, 128  ;;  %p1975_p5 = scmp.lt.s32.totalorder %s2533_s30, %s2533_s30 }
  0x28   : > { %p1968_p13 = scmp.ne.s32.totalorder %s2533_s30, %s1967_s13  ;;  %p1976_p4 = scmp.lt.s32.totalorder %s1967_s13, %s1967_s13 }
  0x2a   : > { %p1970_p0 = pnand %p1968_p13, %p2562_p8  ;;  %p1977_p7 = por %p1976_p4, %p1975_p5 }
  0x2c   : > { %p1971_p2 = pneg %p1970_p0 }
  0x2e   : > { %p1978_p9 = pnand %p1977_p7, %p1971_p2 }
  0x30   : > { %1981 = shalt.err (!%p1978_p9)
}
  0x31   : > { %1829 = dma.hbm_to_vmem [thread:$0]  (!%p2546_p6), %s3079_s1, 128, %s2533_s30, [#allocation8]  }
  0x32   : > { %s3081_s3 = sld [smem:[#allocation39_spill]] }
  0x38   : > { %s1982_s16 = scalar_lea.hbm %s3081_s3, 128 }
  0x39   : > { %p1983_p10 = scmp.ne.s32.totalorder %s3081_s3, %s1982_s16  ;;  %p1989_p12 = scmp.lt.u32.totalorder %s1982_s16, %s3081_s3 }
  0x3b   : > { %p1985_p4 = pnand %p1983_p10, %p2562_p8 }
  0x3d   : > { %p1986_p11 = pneg %p1985_p4 }
  0x3f   : > { %p1991_p13 = pnand %p1989_p12, %p1986_p11 }
  0x41   : > { %1994 = shalt.err (!%p1991_p13)
}
  0x42   : > { %s1995_s30 = scalar_lea.vmem %s2542_s17, 128  ;;  %p2003_p7 = scmp.lt.s32.totalorder %s2542_s17, %s2542_s17 }
  0x43   : > { %p1996_p0 = scmp.ne.s32.totalorder %s2542_s17, %s1995_s30  ;;  %p2004_p9 = scmp.lt.s32.totalorder %s1995_s30, %s1995_s30 }
  0x45   : > { %p1998_p2 = pnand %p1996_p0, %p2562_p8  ;;  %p2005_p10 = por %p2004_p9, %p2003_p7 }
  0x47   : > { %p1999_p5 = pneg %p1998_p2 }
  0x49   : > { %p2006_p4 = pnand %p2005_p10, %p1999_p5 }
  0x4b   : > { %2009 = shalt.err (!%p2006_p4)
}
  0x4c   : > { %1835 = dma.hbm_to_vmem [thread:$0]  (!%p2546_p6), %s3081_s3, 128, %s2542_s17, [#allocation11]  }
  0x4d   : > { %s2010_s24 = scalar_lea.hbm %s3052_s5, 128 }
  0x4e   : > { %p2011_p11 = scmp.ne.s32.totalorder %s3052_s5, %s2010_s24  ;;  %p2017_p0 = scmp.lt.u32.totalorder %s2010_s24, %s3052_s5 }
  0x50   : > { %p2013_p12 = pnand %p2011_p11, %p2562_p8 }
  0x52   : > { %p2014_p13 = pneg %p2013_p12 }
  0x54   : > { %p2019_p2 = pnand %p2017_p0, %p2014_p13 }
  0x56   : > { %2022 = shalt.err (!%p2019_p2)
}
  0x57   : > { %s2023_s17 = scalar_lea.vmem %s2550_s19, 128  ;;  %p2031_p10 = scmp.lt.s32.totalorder %s2550_s19, %s2550_s19 }
  0x58   : > { %p2024_p5 = scmp.ne.s32.totalorder %s2550_s19, %s2023_s17  ;;  %p2032_p4 = scmp.lt.s32.totalorder %s2023_s17, %s2023_s17 }
  0x5a   : > { %p2026_p7 = pnand %p2024_p5, %p2562_p8  ;;  %p2033_p11 = por %p2032_p4, %p2031_p10 }
  0x5c   : > { %p2027_p9 = pneg %p2026_p7 }
  0x5e   : > { %p2034_p12 = pnand %p2033_p11, %p2027_p9 }
  0x60   : > { %2037 = shalt.err (!%p2034_p12)
}
  0x61   : > { %1841 = dma.hbm_to_vmem [thread:$0]  (!%p2546_p6), %s3052_s5, 128, %s2550_s19, [#allocation14]  }
  0x62   : > { %s2038_s23 = scalar_lea.hbm %s3054_s7, 256 }
  0x63   : > { %p2039_p13 = scmp.ne.s32.totalorder %s3054_s7, %s2038_s23  ;;  %p2045_p5 = scmp.lt.u32.totalorder %s2038_s23, %s3054_s7 }
  0x65   : > { %p2041_p0 = pnand %p2039_p13, %p2562_p8 }
  0x67   : > { %p2042_p2 = pneg %p2041_p0 }
  0x69   : > { %p2047_p7 = pnand %p2045_p5, %p2042_p2 }
  0x6b   : > { %2050 = shalt.err (!%p2047_p7)
}
  0x6c   : > { %s2051_s13 = scalar_lea.vmem %s423_s22, 256  ;;  %p2059_p11 = scmp.lt.s32.totalorder %s423_s22, %s423_s22 }
  0x6d   : > { %p2052_p9 = scmp.ne.s32.totalorder %s423_s22, %s2051_s13  ;;  %p2060_p12 = scmp.lt.s32.totalorder %s2051_s13, %s2051_s13 }
  0x6f   : > { %p2054_p10 = pnand %p2052_p9, %p2562_p8  ;;  %p2061_p1 = por %p2060_p12, %p2059_p11 }
  0x71   : > { %p2055_p4 = pneg %p2054_p10 }
  0x73   : > { %p2062_p3 = pnand %p2061_p1, %p2055_p4 }
  0x75   : > { %2065 = shalt.err (!%p2062_p3)
}
  0x76   : > { %s2416_s19 = smov 128   ;;  %s2417_s17 = smov 8  }
  0x77   : > { %1847 = dma.hbm_to_vmem [thread:$0]  (!%p2546_p6), %s3054_s7, 256, %s423_s22, [#allocation17], %s2416_s19, %s2416_s19, %s2417_s17  }
  0x78   : > { %s2418_s14 = smov [#allocation19]   ;;  %s2419_s23 = smov [#allocation22]  }
  0x79   : > { %s448_s15 = sshll.u32 %s2418_s14, 4  ;;  %s474_s24 = sshll.u32 %s2419_s23, 4  ;;  %s449_s15 = int_to_ptr.vmem [resolvable:$true] %s448_s15  ;;  %s2651_s24 = int_to_ptr.vmem [resolvable:$true] %s474_s24 }
  0x7a   : > { %s2066_s21 = scalar_lea.hbm %s3056_s9, 256 }
  0x7b   : > { %p2067_p1 = scmp.ne.s32.totalorder %s3056_s9, %s2066_s21  ;;  %p2073_p0 = scmp.lt.u32.totalorder %s2066_s21, %s3056_s9 }
  0x7d   : > { %p2069_p3 = pnand %p2067_p1, %p2562_p8 }
  0x7f   : > { %p2070_p13 = pneg %p2069_p3 }
  0x81   : > { %p2075_p2 = pnand %p2073_p0, %p2070_p13 }
  0x83   : > { %2078 = shalt.err (!%p2075_p2)
}
  0x84   : > { %s2079_s0 = scalar_lea.vmem %s449_s15, 256  ;;  %p2087_p10 = scmp.lt.s32.totalorder %s449_s15, %s449_s15 }
  0x85   : > { %p2080_p5 = scmp.ne.s32.totalorder %s449_s15, %s2079_s0  ;;  %p2088_p4 = scmp.lt.s32.totalorder %s2079_s0, %s2079_s0 }
  0x87   : > { %p2082_p7 = pnand %p2080_p5, %p2562_p8  ;;  %p2089_p11 = por %p2088_p4, %p2087_p10 }
  0x89   : > { %p2083_p9 = pneg %p2082_p7 }
  0x8b   : > { %p2090_p12 = pnand %p2089_p11, %p2083_p9 }
  0x8d   : > { %2093 = shalt.err (!%p2090_p12)
}
  0x8e   : > { %1853 = dma.hbm_to_vmem [thread:$0]  (!%p2546_p6), %s3056_s9, 256, %s449_s15, [#allocation20], %s2416_s19, %s2416_s19, %s2417_s17  }
  0x8f   : > { %s2094_s16 = scalar_lea.hbm %s3058_s11, 256 }
  0x90   : > { %p2095_p1 = scmp.ne.s32.totalorder %s3058_s11, %s2094_s16  ;;  %p2101_p0 = scmp.lt.u32.totalorder %s2094_s16, %s3058_s11 }
  0x92   : > { %p2097_p3 = pnand %p2095_p1, %p2562_p8 }
  0x94   : > { %p2098_p13 = pneg %p2097_p3 }
  0x96   : > { %p2103_p2 = pnand %p2101_p0, %p2098_p13 }
  0x98   : > { %2106 = shalt.err (!%p2103_p2)
}
  0x99   : > { %s2107_s15 = scalar_lea.vmem %s2651_s24, 256  ;;  %p2115_p10 = scmp.lt.s32.totalorder %s2651_s24, %s2651_s24 }
  0x9a   : > { %p2108_p5 = scmp.ne.s32.totalorder %s2651_s24, %s2107_s15  ;;  %p2116_p4 = scmp.lt.s32.totalorder %s2107_s15, %s2107_s15 }
  0x9c   : > { %p2110_p7 = pnand %p2108_p5, %p2562_p8  ;;  %p2117_p11 = por %p2116_p4, %p2115_p10 }
  0x9e   : > { %p2111_p9 = pneg %p2110_p7 }
  0xa0   : > { %p2118_p12 = pnand %p2117_p11, %p2111_p9 }
  0xa2   : > { %2121 = shalt.err (!%p2118_p12)
}
  0xa3   : > { %1859 = dma.hbm_to_vmem [thread:$0]  (!%p2546_p6), %s3058_s11, 256, %s2651_s24, [#allocation23], %s2416_s19, %s2416_s19, %s2417_s17  }
  0xa4   : > { %s2420_s14 = smov [#allocation9]   ;;  %s2421_s29 = smov [#allocation12]  }
  0xa5   : > { %s368_s23 = sshll.u32 %s2420_s14, 4  ;;  %s390_s16 = sshll.u32 %s2421_s29, 4  ;;  %s369_s23 = int_to_ptr.vmem [resolvable:$true] %s368_s23  ;;  %s2700_s16 = int_to_ptr.vmem [resolvable:$true] %s390_s16 }
  0xa6   : > { %s3082_s2 = sld [smem:[#allocation38_spill]] }
  0xac   : > { %s2122_s30 = scalar_lea.hbm %s3082_s2, 128 }
  0xad   : > { %p2123_p1 = scmp.ne.s32.totalorder %s3082_s2, %s2122_s30  ;;  %p2129_p0 = scmp.lt.u32.totalorder %s2122_s30, %s3082_s2 }
  0xaf   : > { %p2125_p3 = pnand %p2123_p1, %p2562_p8 }
  0xb1   : > { %p2126_p13 = pneg %p2125_p3 }
  0xb3   : > { %p2131_p2 = pnand %p2129_p0, %p2126_p13 }
  0xb5   : > { %2134 = shalt.err (!%p2131_p2)
}
  0xb6   : > { %s2135_s1 = scalar_lea.vmem %s369_s23, 128  ;;  %p2143_p10 = scmp.lt.s32.totalorder %s369_s23, %s369_s23 }
  0xb7   : > { %p2136_p5 = scmp.ne.s32.totalorder %s369_s23, %s2135_s1  ;;  %p2144_p4 = scmp.lt.s32.totalorder %s2135_s1, %s2135_s1 }
  0xb9   : > { %p2138_p7 = pnand %p2136_p5, %p2562_p8  ;;  %p2145_p11 = por %p2144_p4, %p2143_p10 }
  0xbb   : > { %p2139_p9 = pneg %p2138_p7 }
  0xbd   : > { %p2146_p12 = pnand %p2145_p11, %p2139_p9 }
  0xbf   : > { %2149 = shalt.err (!%p2146_p12)
}
  0xc0   : > { %1832 = dma.hbm_to_vmem [thread:$0]  (!%p2546_p6), %s3082_s2, 128, %s369_s23, [#allocation8]  }
  0xc1   : > { %s2150_s30 = scalar_lea.hbm %s3051_s4, 128 }
  0xc2   : > { %p2151_p1 = scmp.ne.s32.totalorder %s3051_s4, %s2150_s30  ;;  %p2157_p0 = scmp.lt.u32.totalorder %s2150_s30, %s3051_s4 }
  0xc4   : > { %p2153_p3 = pnand %p2151_p1, %p2562_p8 }
  0xc6   : > { %p2154_p13 = pneg %p2153_p3 }
  0xc8   : > { %p2159_p2 = pnand %p2157_p0, %p2154_p13 }
  0xca   : > { %2162 = shalt.err (!%p2159_p2)
}
  0xcb   : > { %s2163_s23 = scalar_lea.vmem %s2700_s16, 128  ;;  %p2171_p10 = scmp.lt.s32.totalorder %s2700_s16, %s2700_s16 }
  0xcc   : > { %p2164_p5 = scmp.ne.s32.totalorder %s2700_s16, %s2163_s23  ;;  %p2172_p4 = scmp.lt.s32.totalorder %s2163_s23, %s2163_s23 }
  0xce   : > { %p2166_p7 = pnand %p2164_p5, %p2562_p8  ;;  %p2173_p11 = por %p2172_p4, %p2171_p10 }
  0xd0   : > { %p2167_p9 = pneg %p2166_p7 }
  0xd2   : > { %p2174_p12 = pnand %p2173_p11, %p2167_p9 }
  0xd4   : > { %2177 = shalt.err (!%p2174_p12)
}
  0xd5   : > { %1838 = dma.hbm_to_vmem [thread:$0]  (!%p2546_p6), %s3051_s4, 128, %s2700_s16, [#allocation11]  }
  0xd6   : > { %s2422_s29 = smov [#allocation15]   ;;  %s2423_s13 = smov [#allocation18]  }
  0xd7   : > { %s412_s21 = sshll.u32 %s2422_s29, 4  ;;  %s435_s30 = sshll.u32 %s2423_s13, 4  ;;  %s413_s21 = int_to_ptr.vmem [resolvable:$true] %s412_s21  ;;  %s2743_s30 = int_to_ptr.vmem [resolvable:$true] %s435_s30 }
  0xd8   : > { %s2178_s0 = scalar_lea.hbm %s3053_s6, 128 }
  0xd9   : > { %p2179_p1 = scmp.ne.s32.totalorder %s3053_s6, %s2178_s0  ;;  %p2185_p0 = scmp.lt.u32.totalorder %s2178_s0, %s3053_s6 }
  0xdb   : > { %p2181_p3 = pnand %p2179_p1, %p2562_p8 }
  0xdd   : > { %p2182_p13 = pneg %p2181_p3 }
  0xdf   : > { %p2187_p2 = pnand %p2185_p0, %p2182_p13 }
  0xe1   : > { %2190 = shalt.err (!%p2187_p2)
}
  0xe2   : > { %s2191_s14 = scalar_lea.vmem %s413_s21, 128  ;;  %p2199_p10 = scmp.lt.s32.totalorder %s413_s21, %s413_s21 }
  0xe3   : > { %p2192_p5 = scmp.ne.s32.totalorder %s413_s21, %s2191_s14  ;;  %p2200_p4 = scmp.lt.s32.totalorder %s2191_s14, %s2191_s14 }
  0xe5   : > { %p2194_p7 = pnand %p2192_p5, %p2562_p8  ;;  %p2201_p11 = por %p2200_p4, %p2199_p10 }
  0xe7   : > { %p2195_p9 = pneg %p2194_p7 }
  0xe9   : > { %p2202_p12 = pnand %p2201_p11, %p2195_p9 }
  0xeb   : > { %2205 = shalt.err (!%p2202_p12)
}
  0xec   : > { %1844 = dma.hbm_to_vmem [thread:$0]  (!%p2546_p6), %s3053_s6, 128, %s413_s21, [#allocation14]  }
  0xed   : > { %s2206_s0 = scalar_lea.hbm %s3055_s8, 256 }
  0xee   : > { %p2207_p1 = scmp.ne.s32.totalorder %s3055_s8, %s2206_s0  ;;  %p2213_p0 = scmp.lt.u32.totalorder %s2206_s0, %s3055_s8 }
  0xf0   : > { %p2209_p3 = pnand %p2207_p1, %p2562_p8 }
  0xf2   : > { %p2210_p13 = pneg %p2209_p3 }
  0xf4   : > { %p2215_p2 = pnand %p2213_p0, %p2210_p13 }
  0xf6   : > { %2218 = shalt.err (!%p2215_p2)
}
  0xf7   : > { %s2219_s21 = scalar_lea.vmem %s2743_s30, 256  ;;  %p2227_p10 = scmp.lt.s32.totalorder %s2743_s30, %s2743_s30 }
  0xf8   : > { %p2220_p5 = scmp.ne.s32.totalorder %s2743_s30, %s2219_s21  ;;  %p2228_p4 = scmp.lt.s32.totalorder %s2219_s21, %s2219_s21 }
  0xfa   : > { %p2222_p7 = pnand %p2220_p5, %p2562_p8  ;;  %p2229_p11 = por %p2228_p4, %p2227_p10 }
  0xfc   : > { %p2223_p9 = pneg %p2222_p7 }
  0xfe   : > { %p2230_p12 = pnand %p2229_p11, %p2223_p9 }
 0x100   : > { %2233 = shalt.err (!%p2230_p12)
}
 0x101   : > { %1850 = dma.hbm_to_vmem [thread:$0]  (!%p2546_p6), %s3055_s8, 256, %s2743_s30, [#allocation17], %s2416_s19, %s2416_s19, %s2417_s17  }
 0x102   : > { %s2424_s13 = smov [#allocation21]   ;;  %s2425_s15 = smov [#allocation24]  }
 0x103   : > { %s461_s22 = sshll.u32 %s2424_s13, 4  ;;  %s487_s0 = sshll.u32 %s2425_s15, 4  ;;  %s462_s22 = int_to_ptr.vmem [resolvable:$true] %s461_s22  ;;  %s2789_s0 = int_to_ptr.vmem [resolvable:$true] %s487_s0 }
 0x104   : > { %s2234_s1 = scalar_lea.hbm %s3057_s10, 256 }
 0x105   : > { %p2235_p1 = scmp.ne.s32.totalorder %s3057_s10, %s2234_s1  ;;  %p2241_p0 = scmp.lt.u32.totalorder %s2234_s1, %s3057_s10 }
 0x107   : > { %p2237_p3 = pnand %p2235_p1, %p2562_p8 }
 0x109   : > { %p2238_p13 = pneg %p2237_p3 }
 0x10b   : > { %p2243_p2 = pnand %p2241_p0, %p2238_p13 }
 0x10d   : > { %2246 = shalt.err (!%p2243_p2)
}
 0x10e   : > { %s2247_s29 = scalar_lea.vmem %s462_s22, 256  ;;  %p2255_p10 = scmp.lt.s32.totalorder %s462_s22, %s462_s22 }
 0x10f   : > { %p2248_p5 = scmp.ne.s32.totalorder %s462_s22, %s2247_s29  ;;  %p2256_p4 = scmp.lt.s32.totalorder %s2247_s29, %s2247_s29 }
 0x111   : > { %p2250_p7 = pnand %p2248_p5, %p2562_p8  ;;  %p2257_p11 = por %p2256_p4, %p2255_p10 }
 0x113   : > { %p2251_p9 = pneg %p2250_p7 }
 0x115   : > { %p2258_p12 = pnand %p2257_p11, %p2251_p9 }
 0x117   : > { %2261 = shalt.err (!%p2258_p12)
}
 0x118   : > { %1856 = dma.hbm_to_vmem [thread:$0]  (!%p2546_p6), %s3057_s10, 256, %s462_s22, [#allocation20], %s2416_s19, %s2416_s19, %s2417_s17  }
 0x119   : > { %s2262_s1 = scalar_lea.hbm %s3059_s12, 256 }
 0x11a   : > { %p2263_p1 = scmp.ne.s32.totalorder %s3059_s12, %s2262_s1  ;;  %p2269_p0 = scmp.lt.u32.totalorder %s2262_s1, %s3059_s12 }
 0x11c   : > { %p2265_p3 = pnand %p2263_p1, %p2562_p8 }
 0x11e   : > { %p2266_p13 = pneg %p2265_p3 }
 0x120   : > { %p2271_p2 = pnand %p2269_p0, %p2266_p13 }
 0x122   : > { %2274 = shalt.err (!%p2271_p2)
}
 0x123   : > { %s2275_s22 = scalar_lea.vmem %s2789_s0, 256  ;;  %p2283_p10 = scmp.lt.s32.totalorder %s2789_s0, %s2789_s0 }
 0x124   : > { %p2276_p5 = scmp.ne.s32.totalorder %s2789_s0, %s2275_s22  ;;  %p2284_p4 = scmp.lt.s32.totalorder %s2275_s22, %s2275_s22 }
 0x126   : > { %p2278_p7 = pnand %p2276_p5, %p2562_p8  ;;  %p2285_p11 = por %p2284_p4, %p2283_p10 }
 0x128   : > { %p2279_p9 = pneg %p2278_p7 }
 0x12a   : > { %p2286_p12 = pnand %p2285_p11, %p2279_p9 }
 0x12c   : > { %2289 = shalt.err (!%p2286_p12)
}
 0x12d   : > { %s3083_s18 = sld [smem:[#allocation34_spill]]  ;;  %s1648_s20 = sadd.s32 4294967294, %s2410_s28  }
 0x12e   : > { %1862 = dma.hbm_to_vmem [thread:$0]  (!%p2546_p6), %s3059_s12, 256, %s2789_s0, [#allocation23], %s2416_s19, %s2416_s19, %s2417_s17  }
 0x12f   : > { %s2840_s15 = sadd.s32 1, %s2410_s28   ;;  %s42_s23 = sadd.s32 1, %s2406_s27 }
 0x130   : > { %s39_s24 = ssub.s32 %s2410_s28, %s2840_s15  ;;  %p49_p1 = scmp.ne.s32.totalorder %s2406_s27, %s2402_s26 }
 0x131   : > { %p40_p8 = scmp.eq.s32.totalorder %s39_s24, 0  ;;  %p50_p3 = scmp.eq.s32.totalorder %s2410_s28, 0 }
 0x132   : > { %p55_p13 = scmp.ne.s32.totalorder %s2402_s26, %s2398_s25  ;;  %p337_p7 = scmp.eq.s32.totalorder %s1648_s20, 1 }
 0x133   : > { %s2851_s1 = scalar_select %p40_p8, %s2406_s27, %s42_s23  }
 0x134   : > { %p2853_p0 = por %p50_p3, %p49_p1  ;;  %p3085_p2 = scmp.eq.s32.totalorder %s3083_s18, 0 }
 0x135   : > { %p331_p5 = scmp.eq.s32.totalorder %s3083_s18, 1  ;;  %p1883_p9 = scmp.lt.s32.totalorder %s2410_s28, 2 }
 0x136   : > { %p2859_p6 = por %p3085_p2, %p55_p13  ;;  %s501_s17 = sand.u32 1, %s2406_s27  }
 0x137   : > { %p2866_p10 = por %p331_p5, %p49_p1  ;;  %p2870_p4 = por %p337_p7, %p55_p13 }
 0x138   : > { %s1663_s14 = sshll.u32 %s501_s17, 2  ;;  %s1664_s30 = sshll.u32 %s2410_s28, 6 }
 0x139   : > { %s3087_s0 = scalar_select %p2866_p10, 1, 0 }
 0x13a   : > { %s3088_s21 = scalar_select %p2870_p4, 1, 0 }
 0x13b   : > { %s3089_s13 = sld [smem:[#allocation36_spill]]  ;;  %s505_s18 = scalar_lea.vmem [#allocation4], %s1663_s14 }
 0x13c   : > { %s512_s20 = sshll.u32 %s505_s18, 4  ;;  %p2884_p11 = pnand %p1883_p9, %p2853_p0  ;;  %s2880_s20 = int_to_ptr.vmem [resolvable:$true] %s512_s20 }
 0x13d   : > { %s502_s2 = scalar_lea.sflag [#allocation5], %s501_s17 }
 0x13e   : > { %p2292_p8 = pneg %p2884_p11 }
 0x141   : > { %s2878_s24 = scalar_lea.hbm %s3089_s13, %s1664_s30  ;;  %s2295_s22 = scalar_lea.hbm %s3089_s13, 128 }
 0x142   : > { %s2290_s3 = scalar_lea.hbm %s2878_s24, 64  ;;  %p2296_p13 = scmp.lt.u32.totalorder %s2878_s24, %s3089_s13 }
 0x143   : > { %p2291_p12 = scmp.ne.s32.totalorder %s2878_s24, %s2290_s3  ;;  %p2297_p0 = scmp.lt.u32.totalorder %s2295_s22, %s2290_s3 }
 0x144   : > { %p2299_p5 = scmp.lt.u32.totalorder %s2290_s3, %s2878_s24 }
 0x145   : > { %p2293_p1 = pnand %p2292_p8, %p2291_p12  ;;  %p2298_p2 = por %p2297_p0, %p2296_p13 }
 0x147   : > { %p2294_p3 = pneg %p2293_p1  ;;  %p2300_p7 = por %p2299_p5, %p2298_p2 }
 0x149   : > { %p2301_p9 = pnand %p2300_p7, %p2294_p3 }
 0x14b   : > { %2304 = shalt.err (!%p2301_p9)
}
 0x14c   : > { %s2305_s17 = scalar_lea.vmem %s2880_s20, 64  ;;  %s2426_s18 = smov [#allocation4]  }
 0x14d   : > { %p2306_p12 = scmp.ne.s32.totalorder %s2880_s20, %s2305_s17  ;;  %s2310_s14 = sshll.u32 %s2426_s18, 4  ;;  %s2311_s14 = int_to_ptr.vmem [resolvable:$false] %s2310_s14 }
 0x14e   : > { %s2312_s30 = scalar_lea.vmem %s2311_s14, 128  ;;  %p2313_p10 = scmp.lt.s32.totalorder %s2880_s20, %s2311_s14 }
 0x14f   : > { %p2308_p1 = pnand %p2306_p12, %p2292_p8  ;;  %p2314_p13 = scmp.lt.s32.totalorder %s2312_s30, %s2305_s17 }
 0x151   : > { %p2309_p4 = pneg %p2308_p1  ;;  %p2315_p0 = por %p2314_p13, %p2313_p10 }
 0x153   : > { %p2316_p2 = pnand %p2315_p0, %p2309_p4 }
 0x155   : > { %2319 = shalt.err (!%p2316_p2)
}
 0x156   : > { %1866 = dma.hbm_to_vmem [thread:$0]  (!%p2884_p11), %s2878_s24, 64, %s2880_s20, %s502_s2  }
 0x157   : > { %s3091_s3 = sld [smem:[#allocation35_spill]] }
 0x15d   : > { %p3092_p3 = scmp.ne.s32.totalorder %s3091_s3, 0 }
 0x15e   : > { %s2916_s22 = sand.u32 (!%p3092_p3), 1, %s2402_s26  }
 0x15f   : > { %521 = sbr.rel (%p3092_p3) target bundleno = 2255 (0x8cf), region = 72  ;;  %s1666_s16 = sshll.u32 (!%p3092_p3), %s2916_s22, 2 }
 0x160   : > { %s524_s29 = scalar_lea.sflag (!%p3092_p3), [#allocation5], %s2916_s22  ;;  %s527_s17 = scalar_lea.vmem (!%p3092_p3), [#allocation4], %s1666_s16 }
 0x166   : > { %2365 = dma.done.wait (%p2859_p6), %s524_s29, 64  }
 0x167   : > { %2367 = vsyncadd (%p2859_p6), %s524_s29, 4294967232  ;;  %s3093_s23 = sld [smem:[#allocation34_spill]] }
 0x16d   : > { %p3094_p10 = scmp.eq.s32.totalorder %s3093_s23, 0 }
 0x16f   : > { %2369 = dma.done.wait (%p3094_p10), [#allocation8], 256   ;;  %p3095_p4 = pmov %p3094_p10 }
 0x171   : > { %2371 = vsyncadd (%p3095_p4), [#allocation8], 4294967040  ;;  %p3096_p11 = pmov %p3095_p4 }
 0x172   : > { %p3097_p8 = pmov %p3095_p4 }
 0x173   : > { %2373 = dma.done.wait (%p3096_p11), [#allocation11], 256  }
 0x174   : > { %2375 = vsyncadd (%p3097_p8), [#allocation11], 4294967040  ;;  %p3098_p5 = pmov %p3095_p4 }
 0x175   : > { %p3099_p7 = pmov %p3095_p4 }
 0x176   : > { %2377 = dma.done.wait (%p3098_p5), [#allocation14], 256  }
 0x177   : > { %2379 = vsyncadd (%p3099_p7), [#allocation14], 4294967040  ;;  %p3100_p6 = pmov %p3095_p4 }
 0x178   : > { %p3101_p9 = pmov %p3095_p4 }
 0x179   : > { %2381 = dma.done.wait (%p3100_p6), [#allocation17], 512  }
 0x17a   : > { %2383 = vsyncadd (%p3101_p9), [#allocation17], 4294966784  ;;  %p3102_p12 = pmov %p3095_p4 }
 0x17b   : > { %p3103_p1 = pmov %p3095_p4 }
 0x17c   : > { %2385 = dma.done.wait (%p3102_p12), [#allocation20], 512  }
 0x17d   : > { %2387 = vsyncadd (%p3103_p1), [#allocation20], 4294966784  ;;  %p3104_p13 = pmov %p3103_p1 }
 0x17e   : > { %p3105_p0 = pmov %p3103_p1 }
 0x17f   : > { %2389 = dma.done.wait (%p3104_p13), [#allocation23], 512  }
 0x180   : > { %2391 = vsyncadd (%p3105_p0), [#allocation23], 4294966784  ;;  %v2427_v0 = vmov 0.0   ;;  %vm2428_vm0 = vmmov 0   ;;  %vm624_vm1 = vcmask 1043456   ;;  %vm620_vm2 = vcmask 31744  }
 0x181   : > { %1727 = vmatprep.subr.mxu1 %v2427_v0  ;;  %1729 = vmatprep.mubr.msk.f32.mxu1 %vm2428_vm0, %v2427_v0  ;;  %v618_v1 = vld [vmem:[%s527_s17] sm:$0xf]  ;;  %v698_v2 = vld [vmem:[#allocation9] sm:$0xff]  ;;  %v619_v3 = vld [vmem:[#allocation7] sm:$0xff]  ;;  %v2429_v4 = vmov 0   ;;  %vm772_vm3 = vcmask 7168  }
 0x182   : > { %1722 = vmatprep.subr.mxu0 %v2427_v0  ;;  %1724 = vmatprep.mubr.msk.f32.mxu0 %vm2428_vm0, %v2427_v0  ;;  %s2430_s2 = smov 127   ;;  %s2431_s19 = smov 1   ;;  %v792_v9 = vld [vmem:[#allocation10] sm:$0xff]  ;;  %vm783_vm4 = vcmask 130056   ;;  %vm789_vm5 = vcmask 138368   ;;  %vm801_vm6 = vcmask 64512  }
 0x183   : > { %1728 = vmatpush3.msk.msra.mxu1 %vm624_vm1, %v618_v1  ;;  %1723 = vmatpush3.msk.msra.mxu0 %vm624_vm1, %v618_v1  ;;  %v875_v18 = vld [vmem:[#allocation13] sm:$0xff]  ;;  %v800_v19 = vld [vmem:[#allocation12] sm:$0xff]  ;;  %v968_v26 = vld [vmem:[#allocation15] sm:$0xff]  ;;  %vm959_vm7 = vcmask 138248   ;;  %vm965_vm8 = vcmask 146568   ;;  %vm1142_vm9 = vcmask 15360  }
 0x184   : > { %1730 = vmatmul.mubr.msk.f32.vlgmr.msra.gmra.mrb[0].mxu1 %vm620_vm2, %v698_v2  ;;  %1725 = vmatmul.mubr.msk.f32.vlgmr.msra.gmra.mrb[0].mxu0 %vm620_vm2, %v619_v3  ;;  %v1059_v27 = vld [vmem:[#allocation18] sm:$0xff]  ;;  %v976_v28 = vld [vmem:[#allocation16] sm:$0xff]  ;;  %v1060_v35 = vld [vmem:[#allocation18 + $0x8] sm:$0xff]  ;;  %s2432_s24 = smov 126   ;;  %s2433_s20 = smov 2   ;;  %vm1197_vm10 = vcmask 130048  }
 0x185   : > { %1732 = vmatprep.subr.mxu0 %v2427_v0  ;;  %1737 = vmatprep.subr.mxu1 %v2427_v0  ;;  %v977_v36 = vld [vmem:[#allocation16 + $0x8] sm:$0xff]  ;;  %v1179_v46 = vld [vmem:[#allocation19] sm:$0xff]  ;;  %v1390_v47 = vld [vmem:[#allocation24] sm:$0xff]  ;;  %vm1163_vm11 = vcmask 146448   ;;  %vm1174_vm12 = vcmask 162960   ;;  %s1679_s18 = sshll.u32 %s2916_s22, 4 }
 0x186   : > { %1739 = vmatprep.mubr.msk.f32.mxu1 %vm2428_vm0, %v2427_v0  ;;  %1734 = vmatprep.mubr.msk.f32.mxu0 %vm2428_vm0, %v2427_v0  ;;  %v1180_v45 = vld [vmem:[#allocation19 + $0x8] sm:$0xff]  ;;  %v1391_v48 = vld [vmem:[#allocation24 + $0x8] sm:$0xff]  ;;  %v1195_v49 = vld [vmem:[#allocation21] sm:$0xff]  ;;  %s617_s14 = scalar_lea.vmem [#allocation25], %s1679_s18  ;;  %vm1414_vm13 = vcmask 162832   ;;  %s1699_s30 = sshll.u32 %s3093_s23, 8 }
 0x187   : > { %1952 = vset.pattern.permute.xlu1 %v2429_v4  ;;  %1953 = vset.pattern.permute.xlu0 %v2429_v4  ;;  %v1279_v50 = vld [vmem:[#allocation22] sm:$0xff]  ;;  %v1196_v1 = vld [vmem:[#allocation21 + $0x8] sm:$0xff]  ;;  %v1280_v2 = vld [vmem:[#allocation22 + $0x8] sm:$0xff]  ;;  %s1461_s3 = sshll.u32 %s617_s14, 4  ;;  %vm1441_vm14 = vcmask 179360   ;;  %vm1444_vm15 = vcmask 1047728   ;;  %s3001_s3 = int_to_ptr.vmem [resolvable:$true] %s1461_s3 }
 0x188   : > { %s3106_s17 = sld [smem:[#allocation40_spill]]  ;;  %s1448_s23 = scalar_lea.sflag [#allocation6], %s2916_s22 }
 0x189   : > { %p3107_p3 = scmp.ne.s32.totalorder %s3087_s0, 0 }
 0x257   : > { %v768_v5 = vpop.f32.mrb[0].mxu1  ;;  %v694_v6 = vpop.f32.mrb[0].mxu0 }
 0x258   : > { %773 = vst.msk [vmem:[#allocation2] sm:$0xff] %vm772_vm3, %v768_v5  ;;  %775 = vrot.lane.b32.xlu0 %v768_v5, %s2430_s2  ;;  %v1731_v7 = vpop.f32.mrb[1].mxu1  ;;  %v1726_v8 = vpop.f32.mrb[1].mxu0  ;;  %786 = vrot.lane.b32.xlu1 %v694_v6, %s2431_s19 }
 0x25c   : > { %795 = vperm.xlu1 %1952, %v792_v9  }
 0x2ca   : > { %v776_v10 = vpop.permute.xlu0 %775  ;;  %v787_v13 = vpop.permute.xlu1 %786 }
 0x2cb   : > { %v778_v11 = vadd.f32 %v776_v10, %v694_v6 }
 0x2cd   : > { %780 = vrot.lane.b32.xlu0 %v778_v11, %s2431_s19 }
 0x2db   : > { %v796_v14 = vpop.permute.xlu1 %795 }
 0x33f   : > { %v781_v12 = vpop.permute.xlu0 %780 }
 0x340   : > { %784 = vst.msk [vmem:[#allocation2] sm:$0xff] %vm783_vm4, %v781_v12 }
 0x341   : > { %790 = vst.msk [vmem:[#allocation2] sm:$0xff] %vm789_vm5, %v787_v13 }
 0x348   : > { %v791_v15 = vld [vmem:[#allocation2] sm:$0xff] }
 0x349   : > { %v798_v16 = vadd.f32 %v796_v14, %v791_v15 }
 0x34b   : > { %v799_v17 = vmax.f32 %v798_v16, 0.0 }
 0x34d   : > { %1733 = vmatpush3.msra.mxu0 %v799_v17  ;;  %1738 = vmatpush3.msra.mxu1 %v799_v17 }
 0x34e   : > { %1740 = vmatmul.mubr.msk.f32.vlgmr.msra.gmra.mrb[2].mxu1 %vm801_vm6, %v875_v18  ;;  %1735 = vmatmul.mubr.msk.f32.vlgmr.msra.gmra.mrb[2].mxu0 %vm801_vm6, %v800_v19 }
 0x34f   : > { %1749 = vmatprep.mubr.msk.f32.mxu1 %vm801_vm6, %v1059_v27  ;;  %1744 = vmatprep.mubr.msk.f32.mxu0 %vm801_vm6, %v976_v28 }
 0x421   : > { %v945_v20 = vpop.f32.mrb[2].mxu1  ;;  %v871_v21 = vpop.f32.mrb[2].mxu0 }
 0x422   : > { %949 = vst.msk [vmem:[#allocation3] sm:$0xff] %vm772_vm3, %v945_v20  ;;  %951 = vrot.lane.b32.xlu0 %v945_v20, %s2430_s2  ;;  %v1741_v22 = vpop.f32.mrb[3].mxu1  ;;  %v1736_v23 = vpop.f32.mrb[3].mxu0  ;;  %s2999_s2 = scalar_lea.hbm %s3106_s17, %s1699_s30 }
 0x426   : > { %962 = vrot.lane.b32.xlu0 %v871_v21, %s2431_s19 }
 0x494   : > { %v952_v24 = vpop.permute.xlu0 %951 }
 0x495   : > { %v954_v25 = vadd.f32 %v952_v24, %v871_v21 }
 0x497   : > { %956 = vrot.lane.b32.xlu1 %v954_v25, %s2431_s19  ;;  %s2320_s19 = scalar_lea.vmem %s3001_s3, 256 }
 0x498   : > { %v963_v30 = vpop.permute.xlu0 %962  ;;  %p2321_p2 = scmp.ne.s32.totalorder %s3001_s3, %s2320_s19 }
 0x49a   : > { %p2322_p10 = pnand %p2321_p2, %p3107_p3 }
 0x49b   : > { %971 = vperm.xlu1 %1952, %v968_v26  }
 0x49c   : > { %p2323_p4 = pneg %p2322_p10 }
 0x509   : > { %v957_v29 = vpop.permute.xlu1 %956 }
 0x50a   : > { %960 = vst.msk [vmem:[#allocation3] sm:$0xff] %vm959_vm7, %v957_v29 }
 0x50b   : > { %966 = vst.msk [vmem:[#allocation3] sm:$0xff] %vm965_vm8, %v963_v30 }
 0x512   : > { %v967_v31 = vld [vmem:[#allocation3] sm:$0xff] }
 0x51a   : > { %v972_v32 = vpop.permute.xlu1 %971 }
 0x51b   : > { %v974_v33 = vadd.f32 %v972_v32, %v967_v31 }
 0x51d   : > { %v975_v34 = vmax.f32 %v974_v33, 0.0 }
 0x51f   : > { %1742 = vmatprep.subr.mxu0 %v975_v34  ;;  %1747 = vmatprep.subr.mxu1 %v975_v34 }
 0x520   : > { %1743 = vmatpush3.msra.mxu0 %v975_v34  ;;  %1748 = vmatpush3.msra.mxu1 %v975_v34 }
 0x521   : > { %1750 = vmatmul.mubr.msk.f32.vlgmr.msra.gmra.mrb[4].mxu1 %vm801_vm6, %v1060_v35  ;;  %1745 = vmatmul.mubr.msk.f32.vlgmr.msra.gmra.mrb[4].mxu0 %vm801_vm6, %v977_v36 }
 0x522   : > { %1756 = vmatprep.mubr.msk.f32.mxu0 %vm1197_vm10, %v1195_v49  ;;  %1763 = vmatprep.mubr.msk.f32.mxu1 %vm1197_vm10, %v1279_v50 }
 0x5f4   : > { %v1751_v37 = vpop.f32.mrb[4].mxu1  ;;  %v1746_v38 = vpop.f32.mrb[4].mxu0 }
 0x5f5   : > { %1144 = vst.msk [vmem:[#allocation2 + $0x8] sm:$0xff] %vm1142_vm9, %v1751_v37  ;;  %1149 = vrot.lane.b32.xlu1 %v1751_v37, %s2432_s24  ;;  %v1133_v39 = vpop.f32.mrb[5].mxu1  ;;  %v1050_v40 = vpop.f32.mrb[5].mxu0 }
 0x5f6   : > { %1143 = vst.msk [vmem:[#allocation2] sm:$0xff] %vm1142_vm9, %v1133_v39  ;;  %1147 = vrot.lane.b32.xlu0 %v1133_v39, %s2432_s24 }
 0x5f9   : > { %1170 = vrot.lane.b32.xlu1 %v1746_v38, %s2433_s20 }
 0x5fa   : > { %1168 = vrot.lane.b32.xlu0 %v1050_v40, %s2433_s20 }
 0x667   : > { %v1150_v41 = vpop.permute.xlu1 %1149 }
 0x668   : > { %v1154_v42 = vadd.f32 %v1746_v38, %v1150_v41  ;;  %v1148_v43 = vpop.permute.xlu0 %1147 }
 0x669   : > { %v1153_v44 = vadd.f32 %v1148_v43, %v1050_v40 }
 0x66a   : > { %1159 = vrot.lane.b32.xlu1 %v1154_v42, %s2433_s20 }
 0x66b   : > { %1157 = vrot.lane.b32.xlu0 %v1153_v44, %s2433_s20  ;;  %v1171_v51 = vpop.permute.xlu1 %1170 }
 0x66c   : > { %v1169_v52 = vpop.permute.xlu0 %1168 }
 0x66e   : > { %1188 = vperm.xlu1 %1952, %v1180_v45  }
 0x66f   : > { %1183 = vperm.xlu0 %1953, %v1179_v46  }
 0x672   : > { %1394 = vperm.xlu1 %1952, %v1390_v47  }
 0x673   : > { %1399 = vperm.xlu0 %1953, %v1391_v48  }
 0x676   : > { %1421 = vperm.xlu1 %1952, %v1390_v47  }
 0x677   : > { %1426 = vperm.xlu0 %1953, %v1391_v48  }
 0x6dc   : > { %v1160_v53 = vpop.permute.xlu1 %1159 }
 0x6dd   : > { %1165 = vst.msk [vmem:[#allocation2 + $0x8] sm:$0xff] %vm1163_vm11, %v1160_v53  ;;  %v1158_v54 = vpop.permute.xlu0 %1157 }
 0x6de   : > { %1176 = vst.msk [vmem:[#allocation2 + $0x8] sm:$0xff] %vm1174_vm12, %v1171_v51 }
 0x6df   : > { %1164 = vst.msk [vmem:[#allocation2] sm:$0xff] %vm1163_vm11, %v1158_v54 }
 0x6e0   : > { %1175 = vst.msk [vmem:[#allocation2] sm:$0xff] %vm1174_vm12, %v1169_v52 }
 0x6e5   : > { %v1178_v55 = vld [vmem:[#allocation2 + $0x8] sm:$0xff] }
 0x6e7   : > { %v1177_v58 = vld [vmem:[#allocation2] sm:$0xff] }
 0x6ed   : > { %v1189_v56 = vpop.permute.xlu1 %1188 }
 0x6ee   : > { %v1192_v57 = vadd.f32 %v1189_v56, %v1178_v55  ;;  %v1184_v59 = vpop.permute.xlu0 %1183 }
 0x6ef   : > { %v1191_v60 = vadd.f32 %v1184_v59, %v1177_v58 }
 0x6f0   : > { %v1194_v61 = vmax.f32 %v1192_v57, 0.0 }
 0x6f1   : > { %v1193_v62 = vmax.f32 %v1191_v60, 0.0  ;;  %v1395_v8 = vpop.permute.xlu1 %1394 }
 0x6f2   : > { %v1400_v7 = vpop.permute.xlu0 %1399 }
 0x6f3   : > { %v1766_v63 = vpack.c.bf16 %v1194_v61, %v1193_v62 }
 0x6f5   : > { %1767 = vmatprep.subr.bf16.mxu0 %v1766_v63  ;;  %1771 = vmatprep.subr.bf16.mxu1 %v1766_v63  ;;  %v1422_v10 = vpop.permute.xlu1 %1421 }
 0x6f6   : > { %1769 = vmatpush3.bf16.msra.mxu0 %v1766_v63  ;;  %1773 = vmatpush3.bf16.msra.mxu1 %v1766_v63  ;;  %v1427_v9 = vpop.permute.xlu0 %1426 }
 0x6f9   : > { %1757 = vmatmul.mubr.msk.f32.vlgmr.msra.gmra.mrb[6].mxu0 %vm1197_vm10, %v1196_v1  ;;  %1764 = vmatmul.mubr.msk.f32.vlgmr.msra.gmra.mrb[6].mxu1 %vm1197_vm10, %v1280_v2 }
 0x7cc   : > { %v1758_v3 = vpop.f32.mrb[6].mxu0  ;;  %v1765_v4 = vpop.f32.mrb[6].mxu1 }
 0x7cd   : > { %1384 = vrot.lane.b32.xlu0 %v1765_v4, %s2432_s24  ;;  %v1270_v5 = vpop.f32.mrb[7].mxu0  ;;  %v1353_v6 = vpop.f32.mrb[7].mxu1  ;;  %v1430_v17 = vadd.f32 %v1758_v3, %v1427_v9 }
 0x7ce   : > { %1382 = vrot.lane.b32.xlu1 %v1353_v6, %s2432_s24  ;;  %v1429_v19 = vadd.f32 %v1422_v10, %v1270_v5  ;;  %s2434_s24 = smov [#allocation25]  }
 0x7cf   : > { %v1432_v21 = vmax.f32 %v1430_v17, 0.0 }
 0x7d0   : > { %v1431_v22 = vmax.f32 %v1429_v19, 0.0 }
 0x7d1   : > { %1371 = vperm.xlu0 %1953, %v1391_v48  }
 0x7d2   : > { %1366 = vperm.xlu1 %1952, %v1390_v47  }
 0x83f   : > { %v1385_v11 = vpop.permute.xlu0 %1384 }
 0x840   : > { %v1389_v12 = vadd.f32 %v1758_v3, %v1385_v11  ;;  %v1383_v13 = vpop.permute.xlu1 %1382 }
 0x841   : > { %v1388_v14 = vadd.f32 %v1383_v13, %v1270_v5 }
 0x842   : > { %v1403_v15 = vadd.f32 %v1400_v7, %v1389_v12 }
 0x843   : > { %v1402_v16 = vadd.f32 %v1395_v8, %v1388_v14 }
 0x844   : > { %v1405_v18 = vmax.f32 %v1403_v15, 0.0 }
 0x845   : > { %v1404_v20 = vmax.f32 %v1402_v16, 0.0 }
 0x846   : > { %1410 = vrot.lane.b32.xlu0 %v1405_v18, %s2433_s20 }
 0x847   : > { %1408 = vrot.lane.b32.xlu1 %v1404_v20, %s2433_s20 }
 0x84a   : > { %1437 = vrot.lane.b32.xlu0 %v1432_v21, %s2433_s20 }
 0x84b   : > { %1435 = vrot.lane.b32.xlu1 %v1431_v22, %s2433_s20  ;;  %s2324_s20 = sshll.u32 %s2434_s24, 4  ;;  %s2325_s20 = int_to_ptr.vmem [resolvable:$false] %s2324_s20 }
 0x84c   : > { %s2326_s18 = scalar_lea.vmem %s2325_s20, 512  ;;  %p2327_p11 = scmp.lt.s32.totalorder %s3001_s3, %s2325_s20 }
 0x84d   : > { %p2328_p8 = scmp.lt.s32.totalorder %s2326_s18, %s2320_s19 }
 0x84f   : > { %p2329_p5 = por %p2328_p8, %p2327_p11 }
 0x850   : > { %v1372_v23 = vpop.permute.xlu0 %1371 }
 0x851   : > { %v1375_v24 = vadd.f32 %v1765_v4, %v1372_v23  ;;  %v1367_v25 = vpop.permute.xlu1 %1366  ;;  %p2330_p7 = pnand %p2329_p5, %p2323_p4 }
 0x852   : > { %v1374_v26 = vadd.f32 %v1367_v25, %v1353_v6 }
 0x853   : > { %v1377_v27 = vmax.f32 %v1375_v24, 0.0 }
 0x854   : > { %v1376_v28 = vmax.f32 %v1374_v26, 0.0 }
 0x855   : > { %1379 = vst.msk [vmem:[%s617_s14 + $0x8] sm:$0xff] %vm1142_vm9, %v1377_v27 }
 0x856   : > { %1378 = vst.msk [vmem:[%s617_s14] sm:$0xff] %vm1142_vm9, %v1376_v28 }
 0x8b8   : > { %v1411_v29 = vpop.permute.xlu0 %1410 }
 0x8b9   : > { %1416 = vst.msk [vmem:[%s617_s14 + $0x8] sm:$0xff] %vm1414_vm13, %v1411_v29  ;;  %v1409_v30 = vpop.permute.xlu1 %1408 }
 0x8ba   : > { %1415 = vst.msk [vmem:[%s617_s14] sm:$0xff] %vm1414_vm13, %v1409_v30 }
 0x8bc   : > { %v1438_v31 = vpop.permute.xlu0 %1437 }
 0x8bd   : > { %1443 = vst.msk [vmem:[%s617_s14 + $0x8] sm:$0xff] %vm1441_vm14, %v1438_v31  ;;  %v1436_v32 = vpop.permute.xlu1 %1435 }
 0x8be   : > { %1446 = vst.msk [vmem:[%s617_s14 + $0x8] sm:$0xff] %vm1444_vm15, %v2427_v0 }
 0x8bf   : > { %1442 = vst.msk [vmem:[%s617_s14] sm:$0xff] %vm1441_vm14, %v1436_v32 }
 0x8c0   : > { %1445 = vst.msk [vmem:[%s617_s14] sm:$0xff] %vm1444_vm15, %v2427_v0 }
 0x8c1   : > { %2333 = shalt.err (!%p2330_p7)
}
 0x8c2   : > { %s2334_s14 = scalar_lea.hbm %s2999_s2, 256  ;;  %s2338_s29 = scalar_lea.hbm %s3106_s17, 512 }
 0x8c3   : > { %p2335_p6 = scmp.ne.s32.totalorder %s2999_s2, %s2334_s14  ;;  %p2339_p1 = scmp.lt.u32.totalorder %s2999_s2, %s3106_s17 }
 0x8c4   : > { %p2340_p13 = scmp.lt.u32.totalorder %s2338_s29, %s2334_s14  ;;  %p2342_p2 = scmp.lt.u32.totalorder %s2334_s14, %s2999_s2 }
 0x8c5   : > { %p2336_p9 = pnand %p2335_p6, %p3107_p3 }
 0x8c6   : > { %p2341_p0 = por %p2340_p13, %p2339_p1 }
 0x8c7   : > { %p2337_p12 = pneg %p2336_p9 }
 0x8c8   : > { %p2343_p10 = por %p2342_p2, %p2341_p0 }
 0x8ca   : > { %p2344_p4 = pnand %p2343_p10, %p2337_p12 }
 0x8cc   : > { %2347 = shalt.err (!%p2344_p4)
}
 0x8cd   : > { %s2435_s19 = smov 128   ;;  %s2436_s18 = smov 8  }
 0x8ce   : > { %1824 = dma.vmem_to_hbm [thread:$0]  (%p3107_p3), %s3001_s3, 256, %s2999_s2, %s1448_s23, %s2435_s19, %s2435_s19, %s2436_s18  }
 0x8cf PF: > { %s1476_s30 = sand.u32 1, %s2398_s25   ;;  %p3108_p11 = scmp.ne.s32.totalorder %s3088_s21, 0 }
 0x8d0   : > { %p3109_p8 = scmp.ge.s32.totalorder %s2410_s28, 2  ;;  %s1477_s14 = scalar_lea.sflag [#allocation6], %s1476_s30 }
 0x8d2   : > { %p1868_p5 = pnand %p3109_p8, %p3108_p11 }
 0x8d4   : > { %2393 = dma.done.wait (!%p1868_p5), %s1477_s14, 256  }
 0x8d5   : > { %2395 = vsyncadd (!%p1868_p5), %s1477_s14, 4294967040  ;;  %p32_p7 = scmp.ge.s32.totalorder %s2840_s15, 4   ;;  %s3110_s25 = smov %s2402_s26 }
 0x8d6   : > { %s3111_s26 = smov %s2406_s27  ;;  %s3112_s27 = smov %s2851_s1 }
 0x8d7   : > { %s3113_s28 = smov %s2840_s15  ;;  %34 = sbr.rel (!%p32_p7) target bundleno = 17 (0x11), region = 165 }
 0x8de   :  { %1482 = vsyncpa [#allocation5], 1 }
 0x8df   :  { %1484 = vsyncpa [#allocation5 + $0x1], 1 }
 0x8e0   :  { %1485 = vsyncpa [#allocation8], 1 }
 0x8e1   :  { %1486 = vsyncpa [#allocation11], 1 }
 0x8e2   :  { %1487 = vsyncpa [#allocation14], 1 }
 0x8e3   :  { %1488 = vsyncpa [#allocation17], 1 }
 0x8e4   :  { %1489 = vsyncpa [#allocation20], 1 }
 0x8e5   :  { %1490 = vsyncpa [#allocation23], 1 }
 0x8e6   :  { %1491 = vsyncpa [#allocation6], 1 }
 0x8e7   :  { %1493 = vsyncpa [#allocation6 + $0x1], 1 }

</bundles_post_ra>
